<compile_context>
chip_gen: v7x
topology: tpu7x:2x2x1
jax: 0.10.0
libtpu: 0.0.40
codegen_flags: <defaults>
</compile_context>

<pallas_src>
import functools

import jax
import jax.numpy as jnp
from jax.experimental import pallas as pl
from jax.experimental.pallas import tpu as pltpu

N_EMBD = 384          # fixed by the module
BLOCK_SIZE = 256      # max T supported by the module's tril buffer
_NEG = -1e30          # finite causal-mask fill (safe with padded batch blocks)


def _device_kind():
    try:
        return jax.devices()[0].device_kind.lower()
    except Exception:
        return ""


def _bf16_vpu():
    """True on parts with bf16-capable VPU/EUP (v6e, v7x); False on v5e and older."""
    kind = _device_kind()
    return ("v6" in kind) or ("v7" in kind) or ("tpu7" in kind)


def _head_kernel(x_ref, w_ref, o_ref, *, exp_dtype):
    # x_ref: (Bb, T, C)   w_ref: (C, 3H) = [Wq*scale | Wk | Wv]   o_ref: (Bb, T, H)
    Bb, T, C = x_ref.shape
    H = o_ref.shape[-1]
    dt = x_ref.dtype  # MXU operand dtype (bf16 in the fast path)

    # Fused QKV projection: one (Bb*T, C) @ (C, 3H) matmul, fp32 accumulation.
    x2d = x_ref[...].reshape(Bb * T, C)
    qkv = jnp.dot(x2d, w_ref[...], preferred_element_type=jnp.float32)
    qkv = qkv.reshape(Bb, T, 3 * H)

    # Slice + cast q/k/v once per grid step (outside the unrolled q-tile loop) so
    # the mid-vreg (lane offset 64) k slice is relaid out a single time.
    q = qkv[:, :, 0:H].astype(dt)          # already scaled by H**-0.5 (folded into Wq)
    k = qkv[:, :, H:2 * H].astype(dt)
    v = qkv[:, :, 2 * H:3 * H].astype(dt)

    # Tile the attention over q-row chunks; causal structure lets chunk q0 only
    # look at keys [0, q0 + tq).
    TQ = min(128, T)
    for q0 in range(0, T, TQ):
        tq = min(TQ, T - q0)
        kv_len = q0 + tq

        qc = q[:, q0:q0 + tq, :]          # (Bb, tq, H)
        kc = k[:, :kv_len, :]             # (Bb, kv_len, H)
        vc = v[:, :kv_len, :]             # (Bb, kv_len, H)

        # scores: contract last dims, batch over Bb (no materialized k^T)
        s = jax.lax.dot_general(
            qc, kc, (((2,), (2,)), ((0,), (0,))),
            preferred_element_type=jnp.float32)        # (Bb, tq, kv_len) fp32

        # Causal mask: only the diagonal sub-block [q0, kv_len) needs masking;
        # columns [0, q0) are always visible.
        row = jax.lax.broadcasted_iota(jnp.int32, (1, tq, tq), 1)
        col = jax.lax.broadcasted_iota(jnp.int32, (1, tq, tq), 2)
        s_diag = jnp.where(col <= row, s[:, :, q0:kv_len], _NEG)
        if q0 == 0:
            s = s_diag
        else:
            s = jnp.concatenate([s[:, :, :q0], s_diag], axis=-1)

        # Numerically-stable softmax: max / denom / normalization in fp32; the
        # exponent runs in bf16 on v6e/v7x (bf16 EUP/VPU), fp32 on v5e.
        m = jnp.max(s, axis=-1, keepdims=True)
        p = jnp.exp((s - m).astype(exp_dtype))
        denom = jnp.sum(p, axis=-1, keepdims=True, dtype=jnp.float32)
        inv = pl.reciprocal(denom, approx=True)        # EUP vrcp, ~free

        # TODO(synk): dropout(p=0.2) on the attention weights is identity in eval
        # mode; training-mode RNG dropout is not implemented here.

        # Un-normalized P @ V, then scale the small (tq, H) output by 1/denom
        # instead of the (tq, kv_len) probability tile.
        oc = jax.lax.dot_general(
            p.astype(dt), vc, (((2,), (1,)), ((0,), (0,))),
            preferred_element_type=jnp.float32)        # (Bb, tq, H)
        o_ref[:, q0:q0 + tq, :] = (oc * inv).astype(o_ref.dtype)


def fuse_head_weights(wk_t, wq_t, wv_t):
    """Fold 1/sqrt(H) into Wq and fuse [Wq*scale | Wk | Wv] -> (C, 3H).

    Hoisted out of the forward path: call once at parameter-load time.
    """
    H = wq_t.shape[1]
    scale = jnp.float32(H) ** -0.5
    wq_scaled = (wq_t.astype(jnp.float32) * scale).astype(wq_t.dtype)
    return jnp.concatenate([wq_scaled, wk_t, wv_t], axis=1)


def _pick_batch_block(B, T):
    # Target enough projection rows per grid step to amortize the ~0.35 us
    # per-step overhead, sized against per-generation scoped VMEM:
    #   v5e (16 MiB scoped default)          -> ~2048 rows (Bb=8  at T=256)
    #   v6e (32 MiB) / v7x (32 MiB scoped)   -> ~4096 rows (Bb=16 at T=256)
    rows = 4096 if _bf16_vpu() else 2048
    bb = max(1, rows // max(T, 1))
    bb = min(bb, B)
    if B >= 2:
        # Keep >= 2 grid steps so "parallel" can shard across both TensorCores
        # on v7x-class parts.
        bb = min(bb, (B + 1) // 2)
    return bb


def head_forward(x, w_qkv):
    """x: (B, T, C); w_qkv: (C, 3H) fused weight from fuse_head_weights()."""
    B, T, C = x.shape
    assert C == N_EMBD and T <= BLOCK_SIZE
    H3 = w_qkv.shape[1]
    H = H3 // 3

    Bb = _pick_batch_block(B, T)
    grid_b = pl.cdiv(B, Bb)   # no divisibility requirement: boundary block is padded

    exp_dtype = (jnp.bfloat16
                 if (_bf16_vpu() and x.dtype == jnp.bfloat16) else jnp.float32)
    kernel = functools.partial(_head_kernel, exp_dtype=exp_dtype)

    return pl.pallas_call(
        kernel,
        out_shape=jax.ShapeDtypeStruct((B, T, H), x.dtype),
        grid_spec=pltpu.PrefetchScalarGridSpec(
            num_scalar_prefetch=0,
            grid=(grid_b,),
            in_specs=[
                # TODO(synk): consider pipeline_mode=pl.Buffered(3) on x if the
                # softmax fixes expose the x-block DMA latency.
                pl.BlockSpec((Bb, T, C), lambda b: (b, 0, 0)),
                pl.BlockSpec((C, H3), lambda b: (0, 0)),
            ],
            out_specs=pl.BlockSpec((Bb, T, H), lambda b: (b, 0, 0)),
        ),
        compiler_params=pltpu.CompilerParams(
            dimension_semantics=("parallel",)),
    )(x, w_qkv)


def reference_forward(x, wk_t, wq_t, wv_t):
    """Pure-JAX fp32 reference mirroring the PyTorch forward (eval mode)."""
    B, T, C = x.shape
    H = wk_t.shape[1]
    k = x @ wk_t
    q = x @ wq_t
    v = x @ wv_t
    wei = (q @ jnp.swapaxes(k, -2, -1)) * (H ** -0.5)
    mask = jnp.tril(jnp.ones((T, T), dtype=bool))
    wei = jnp.where(mask, wei, -jnp.inf)
    wei = jax.nn.softmax(wei, axis=-1)
    return wei @ v


if __name__ == "__main__":
    key = jax.random.PRNGKey(0)
    head_size = 64
    C = N_EMBD

    kx, kk, kq, kv = jax.random.split(key, 4)
    # nn.Linear(n_embd, head_size, bias=False) weight is (head_size, n_embd);
    # we store the transposed (n_embd, head_size) version directly.
    bound = C ** -0.5
    wk32 = jax.random.uniform(kk, (C, head_size), jnp.float32, -bound, bound)
    wq32 = jax.random.uniform(kq, (C, head_size), jnp.float32, -bound, bound)
    wv32 = jax.random.uniform(kv, (C, head_size), jnp.float32, -bound, bound)

    # bf16 operands (MXU-native); accumulation stays fp32 inside the kernel.
    wk_t = wk32.astype(jnp.bfloat16)
    wq_t = wq32.astype(jnp.bfloat16)
    wv_t = wv32.astype(jnp.bfloat16)

    # Fused weight computed once (parameter-load time), reused by every forward.
    w_qkv = jax.block_until_ready(fuse_head_weights(wk_t, wq_t, wv_t))

    # Small module-default shape plus a full-block-size case that exercises the
    # multi-tile causal path, kv truncation and padded (B % Bb != 0) batch blocks.
    for (B, T) in [(2, 8), (3, 256)]:
        x = jax.random.normal(jax.random.fold_in(kx, T), (B, T, C),
                              dtype=jnp.float32).astype(jnp.bfloat16)
        out = jax.block_until_ready(head_forward(x, w_qkv))
        ref = reference_forward(x.astype(jnp.float32), wk_t.astype(jnp.float32),
                                wq_t.astype(jnp.float32), wv_t.astype(jnp.float32))
        assert out.shape == (B, T, head_size)
        err = jnp.max(jnp.abs(out.astype(jnp.float32) - ref))
        assert jnp.allclose(out.astype(jnp.float32), ref, atol=3e-2, rtol=3e-2), \
            f"mismatch vs reference at B={B}, T={T} (max abs err {err})"

    print("KERNEL_OK")
</pallas_src>

<mosaic_0001>
module attributes {stable_mosaic.version = 11 : i64} {
  func.func @_head_kernel(%arg0: i32, %arg1: memref<1x8x384xbf16, #tpu.memory_space<vmem>>, %arg2: memref<384x192xbf16, #tpu.memory_space<vmem>>, %arg3: memref<1x8x64xbf16, #tpu.memory_space<vmem>>) attributes {dimension_semantics = [#tpu.dimension_semantics<parallel>], iteration_bounds = array<i64: 2>, scalar_prefetch = 0 : i64, scratch_operands = 0 : i64, tpu.core_type = #tpu.core_type<tc>, window_params = [{transform_indices = @transform_0, window_bounds = array<i64: 1, 8, 384>}, {pipeline_mode = #tpu.pipeline_mode<synchronous>, transform_indices = @transform_1, window_bounds = array<i64: 384, 192>}, {transform_indices = @transform_2, window_bounds = array<i64: 1, 8, 64>}]} {
    %c0 = arith.constant 0 : index
    %c0_0 = arith.constant 0 : index
    %c0_1 = arith.constant 0 : index
    %0 = vector.load %arg1[%c0, %c0_0, %c0_1] : memref<1x8x384xbf16, #tpu.memory_space<vmem>>, vector<1x8x384xbf16>
    %1 = vector.shape_cast %0 : vector<1x8x384xbf16> to vector<8x384xbf16>
    %c0_2 = arith.constant 0 : index
    %c0_3 = arith.constant 0 : index
    %2 = vector.load %arg2[%c0_2, %c0_3] : memref<384x192xbf16, #tpu.memory_space<vmem>>, vector<384x192xbf16>
    %cst = arith.constant dense<0.000000e+00> : vector<8x192xf32>
    %3 = tpu.matmul %1, %2, %cst {dimension_numbers = #tpu.dot_dimension_numbers<[1], [0], [0], [1], [0, 0, 1, 1], [], []>} : vector<8x384xbf16>, vector<384x192xbf16>, vector<8x192xf32> -> vector<8x192xf32>
    %4 = vector.shape_cast %3 : vector<8x192xf32> to vector<1x8x192xf32>
    %5 = vector.extract_strided_slice %4 {offsets = [0, 0, 0], sizes = [1, 8, 64], strides = [1, 1, 1]} : vector<1x8x192xf32> to vector<1x8x64xf32>
    %6 = arith.truncf %5 : vector<1x8x64xf32> to vector<1x8x64xbf16>
    %7 = vector.extract_strided_slice %4 {offsets = [0, 0, 64], sizes = [1, 8, 64], strides = [1, 1, 1]} : vector<1x8x192xf32> to vector<1x8x64xf32>
    %8 = arith.truncf %7 : vector<1x8x64xf32> to vector<1x8x64xbf16>
    %9 = vector.extract_strided_slice %4 {offsets = [0, 0, 128], sizes = [1, 8, 64], strides = [1, 1, 1]} : vector<1x8x192xf32> to vector<1x8x64xf32>
    %10 = arith.truncf %9 : vector<1x8x64xf32> to vector<1x8x64xbf16>
    %cst_4 = arith.constant dense<0.000000e+00> : vector<1x8x8xf32>
    %11 = tpu.matmul %6, %8, %cst_4 {dimension_numbers = #tpu.dot_dimension_numbers<[2], [2], [1], [1], [0, 0, 0, 1, 1, 1], [0], [0]>} : vector<1x8x64xbf16>, vector<1x8x64xbf16>, vector<1x8x8xf32> -> vector<1x8x8xf32>
    %12 = tpu.iota {dimensions = array<i32: 1>} : vector<1x8x8xi32>
    %13 = tpu.iota {dimensions = array<i32: 2>} : vector<1x8x8xi32>
    %14 = arith.cmpi sle, %13, %12 : vector<1x8x8xi32>
    %cst_5 = arith.constant -1.000000e+30 : f32
    %15 = vector.broadcast %cst_5 : f32 to vector<1x8x8xf32>
    %16 = arith.select %14, %11, %15 : vector<1x8x8xi1>, vector<1x8x8xf32>
    %cst_6 = arith.constant dense<0xFF800000> : vector<1x8xf32>
    %17 = vector.multi_reduction <maximumf>, %16, %cst_6 [2] : vector<1x8x8xf32> to vector<1x8xf32>
    %18 = vector.shape_cast %17 : vector<1x8xf32> to vector<1x8x1xf32>
    %19 = vector.broadcast %18 : vector<1x8x1xf32> to vector<1x8x8xf32>
    %20 = arith.subf %16, %19 : vector<1x8x8xf32>
    %21 = math.exp %20 : vector<1x8x8xf32>
    %cst_7 = arith.constant dense<0.000000e+00> : vector<1x8xf32>
    %22 = vector.multi_reduction <add>, %21, %cst_7 [2] : vector<1x8x8xf32> to vector<1x8xf32>
    %23 = vector.shape_cast %22 : vector<1x8xf32> to vector<1x8x1xf32>
    %24 = tpu.reciprocal %23 {approx = true} : vector<1x8x1xf32> -> vector<1x8x1xf32>
    %25 = arith.truncf %21 : vector<1x8x8xf32> to vector<1x8x8xbf16>
    %cst_8 = arith.constant dense<0.000000e+00> : vector<1x8x64xf32>
    %26 = tpu.matmul %25, %10, %cst_8 {dimension_numbers = #tpu.dot_dimension_numbers<[2], [1], [1], [2], [0, 0, 0, 1, 1, 2], [0], [0]>} : vector<1x8x8xbf16>, vector<1x8x64xbf16>, vector<1x8x64xf32> -> vector<1x8x64xf32>
    %27 = vector.broadcast %24 : vector<1x8x1xf32> to vector<1x8x64xf32>
    %28 = arith.mulf %26, %27 : vector<1x8x64xf32>
    %29 = arith.truncf %28 : vector<1x8x64xf32> to vector<1x8x64xbf16>
    %c0_9 = arith.constant 0 : index
    %c0_10 = arith.constant 0 : index
    %c0_11 = arith.constant 0 : index
    %30 = vector.load %arg3[%c0_9, %c0_10, %c0_11] : memref<1x8x64xbf16, #tpu.memory_space<vmem>>, vector<1x8x64xbf16>
    tpu.vector_store %arg3[%c0_9, %c0_10, %c0_11], %29 {strides = array<i32>} : memref<1x8x64xbf16, #tpu.memory_space<vmem>>, vector<1x8x64xbf16>,
    return
  }
  func.func @transform_0(%arg0: i32) -> (i32, i32, i32) {
    %c0_i32 = arith.constant 0 : i32
    %c0_i32_0 = arith.constant 0 : i32
    %c0_i32_1 = arith.constant 0 : i32
    return %arg0, %c0_i32, %c0_i32_0 : i32, i32, i32
  }
  func.func @transform_1(%arg0: i32) -> (i32, i32) {
    %c0_i32 = arith.constant 0 : i32
    %c0_i32_0 = arith.constant 0 : i32
    %c0_i32_1 = arith.constant 0 : i32
    return %c0_i32, %c0_i32_0 : i32, i32
  }
  func.func @transform_2(%arg0: i32) -> (i32, i32, i32) {
    %c0_i32 = arith.constant 0 : i32
    %c0_i32_0 = arith.constant 0 : i32
    %c0_i32_1 = arith.constant 0 : i32
    return %arg0, %c0_i32, %c0_i32_0 : i32, i32, i32
  }
}

</mosaic_0001>

<bundles_post_ra>
// kernel: tpu_custom_call.1
= control target key start
LH: loop header
LB: loop body
LE: loop exit
PB: predicated region body
PF: predicated region fallthrough
CT: control target
= control target key end

     0   :  { %7 = vsyncpa [#allocation3], 0  ;;  %s1257_s0 = inlined_call_operand.vmem [shape: bf16[2,8,384], index: 0, kind: input, shape index: {}]   ;;  %s1258_s1 = inlined_call_operand.vmem [shape: bf16[384,192], index: 1, kind: input, shape index: {}]   ;;  %s1259_s2 = inlined_call_operand.hbm [shape: bf16[2,8,64], index: 2, kind: output, shape index: {}]  }
   0x1   :  { %9 = vsyncpa [#allocation3 + $0x1], 0  ;;  %s1008_s9 = smov 0   ;;  %s1010_s10 = smov 0  }
   0x2   :  { %s1012_s11 = smov 0   ;;  %s1014_s12 = smov 0  }
   0x3 LB: > { %s1029_s13 = sadd.s32 4294967295, %s986_s12   ;;  %s720_s14 = sadd.s32 4294967294, %s986_s12   ;;  %s986_s12 = sphi %s1014_s12, %s1265_s12   ;;  %s982_s11 = sphi %s1012_s11, %s1264_s11   ;;  %s978_s10 = sphi %s1010_s10, %s1263_s10   ;;  %s974_s9 = sphi %s1008_s9, %s1262_s9  }
   0x4   : > { %s1033_s15 = sadd.s32 1, %s986_s12   ;;  %s69_s16 = sadd.s32 1, %s982_s11 }
   0x5   : > { %s66_s17 = ssub.s32 %s986_s12, %s1033_s15  ;;  %p79_p0 = scmp.ne.s32.totalorder %s982_s11, %s978_s10 }
   0x6   : > { %p67_p1 = scmp.eq.s32.totalorder %s66_s17, 0  ;;  %p80_p2 = scmp.eq.s32.totalorder %s1029_s13, 1 }
   0x7   : > { %p85_p3 = scmp.ne.s32.totalorder %s978_s10, %s974_s9  ;;  %p86_p4 = scmp.eq.s32.totalorder %s720_s14, 1 }
   0x8   : > { %s1044_s18 = scalar_select %p67_p1, %s982_s11, %s69_s16  }
   0x9   : > { %p1046_p5 = por %p80_p2, %p79_p0  ;;  %p1050_p6 = por %p86_p4, %p85_p3 }
   0xa   : > { %p723_p7 = scmp.ge.s32.totalorder %s986_s12, 1  ;;  %p115_p8 = scmp.lt.s32.totalorder %s986_s12, 3 }
   0xc   : > { %p116_p9 = pnand %p723_p7, %p115_p8 }
   0xd   : > { %v845_v0 = vld [vmem:[%s1258_s1 + $0x4] ss:$8 sps:$4 sm:$0xff] (!%p116_p9)   ;;  %v847_v1 = vld [vmem:[%s1258_s1] ss:$8 sps:$4 sm:$0xff] (!%p116_p9)   ;;  %v988_v2 = vmov (!%p116_p9), 0   ;;  %p137_p10 = scmp.lt.s32.totalorder (!%p116_p9), %s1029_s13, 1 }
   0xe   : > { %119 = sbr.rel (%p116_p9) target bundleno = 1020 (0x3fc), region = 28  ;;  %517 = vmatprep.mubr.bf16.mxu1 (!%p116_p9), %v988_v2  ;;  %444 = vmatprep.subr.bf16.mxu0 (!%p116_p9), %v845_v0  ;;  %v848_v3 = vld [vmem:[%s1258_s1 + $0x14] ss:$8 sps:$4 sm:$0xff] (!%p116_p9)   ;;  %v850_v4 = vld [vmem:[%s1258_s1 + $0x10] ss:$8 sps:$4 sm:$0xff] (!%p116_p9)   ;;  %v989_v57 = vmov (!%p116_p9), 0.0  }
   0xf   : > { %445 = vmatpush1.bf16.msra.mxu0 (!%p116_p9), %v847_v1  ;;  %v851_v5 = vld [vmem:[%s1258_s1 + $0x24] ss:$8 sps:$4 sm:$0xff] (!%p116_p9)   ;;  %v853_v6 = vld [vmem:[%s1258_s1 + $0x20] ss:$8 sps:$4 sm:$0xff] (!%p116_p9)   ;;  %v854_v7 = vld [vmem:[%s1258_s1 + $0x34] ss:$8 sps:$4 sm:$0xff] (!%p116_p9)  }
  0x10   : > { %446 = vmatprep.subr.bf16.mxu0 (!%p116_p9), %v848_v3  ;;  %v856_v8 = vld [vmem:[%s1258_s1 + $0x30] ss:$8 sps:$4 sm:$0xff] (!%p116_p9)   ;;  %v869_v9 = vld [vmem:[%s1258_s1 + $0x104] ss:$8 sps:$4 sm:$0xff] (!%p116_p9)   ;;  %v871_v10 = vld [vmem:[%s1258_s1 + $0x100] ss:$8 sps:$4 sm:$0xff] (!%p116_p9)  }
  0x11   : > { %v857_v11 = vld [vmem:[%s1258_s1 + $0x44] ss:$8 sps:$4 sm:$0xff] (!%p116_p9)   ;;  %485 = vmatprep.subr.bf16.mxu1 (!%p116_p9), %v869_v9  ;;  %v875_v12 = vld [vmem:[%s1258_s1 + $0x114] ss:$8 sps:$4 sm:$0xff] (!%p116_p9)   ;;  %v877_v13 = vld [vmem:[%s1258_s1 + $0x110] ss:$8 sps:$4 sm:$0xff] (!%p116_p9)  }
  0x12   : > { %486 = vmatpush1.bf16.msra.mxu1 (!%p116_p9), %v871_v10  ;;  %v859_v14 = vld [vmem:[%s1258_s1 + $0x40] ss:$8 sps:$4 sm:$0xff] (!%p116_p9)   ;;  %v860_v15 = vld [vmem:[%s1258_s1 + $0x54] ss:$8 sps:$4 sm:$0xff] (!%p116_p9)   ;;  %v881_v16 = vld [vmem:[%s1258_s1 + $0x124] ss:$8 sps:$4 sm:$0xff] (!%p116_p9)  }
  0x13   : > { %447 = vmatpush1.bf16.msra.mxu0 (!%p116_p9), %v850_v4  ;;  %487 = vmatprep.subr.bf16.mxu1 (!%p116_p9), %v875_v12  ;;  %v883_v17 = vld [vmem:[%s1258_s1 + $0x120] ss:$8 sps:$4 sm:$0xff] (!%p116_p9)   ;;  %v862_v18 = vld [vmem:[%s1258_s1 + $0x50] ss:$8 sps:$4 sm:$0xff] (!%p116_p9)   ;;  %v887_v19 = vld [vmem:[%s1258_s1 + $0x134] ss:$8 sps:$4 sm:$0xff] (!%p116_p9)  }
  0x14   : > { %448 = vmatprep.subr.bf16.mxu0 (!%p116_p9), %v851_v5  ;;  %v863_v20 = vld [vmem:[%s1258_s1 + $0x64] ss:$8 sps:$4 sm:$0xff] (!%p116_p9)   ;;  %v889_v21 = vld [vmem:[%s1258_s1 + $0x130] ss:$8 sps:$4 sm:$0xff] (!%p116_p9)   ;;  %v865_v22 = vld [vmem:[%s1258_s1 + $0x60] ss:$8 sps:$4 sm:$0xff] (!%p116_p9)   ;;  %v578_v5 = vlaneseq (!%p116_p9) }
  0x15   : > { %s138_s23 = scalar_select %p137_p10, %s1029_s13, 1  ;;  %v893_v23 = vld [vmem:[%s1258_s1 + $0x144] ss:$8 sps:$4 sm:$0xff]   ;;  %v866_v24 = vld [vmem:[%s1258_s1 + $0x74] ss:$8 sps:$4 sm:$0xff]   ;;  %vm990_vm0 = vmmov 0  }
  0x16   : > { %488 = vmatpush1.bf16.msra.mxu1 %v877_v13  ;;  %v895_v25 = vld [vmem:[%s1258_s1 + $0x140] ss:$8 sps:$4 sm:$0xff]   ;;  %v868_v26 = vld [vmem:[%s1258_s1 + $0x70] ss:$8 sps:$4 sm:$0xff]   ;;  %v899_v27 = vld [vmem:[%s1258_s1 + $0x154] ss:$8 sps:$4 sm:$0xff]  }
  0x17   : > { %449 = vmatpush1.bf16.msra.mxu0 %v853_v6  ;;  %489 = vmatprep.subr.bf16.mxu1 %v881_v16  ;;  %s801_s4 = smul.u32 12, %s138_s23  ;;  %v872_v28 = vld [vmem:[%s1258_s1 + $0x84] ss:$8 sps:$4 sm:$0xff]   ;;  %v901_v29 = vld [vmem:[%s1258_s1 + $0x150] ss:$8 sps:$4 sm:$0xff]   ;;  %s991_s28 = smov 64  }
  0x18   : > { %450 = vmatprep.subr.bf16.mxu0 %v854_v7  ;;  %v874_v30 = vld [vmem:[%s1258_s1 + $0x80] ss:$8 sps:$4 sm:$0xff]   ;;  %v905_v31 = vld [vmem:[%s1258_s1 + $0x164] ss:$8 sps:$4 sm:$0xff]   ;;  %v878_v32 = vld [vmem:[%s1258_s1 + $0x94] ss:$8 sps:$4 sm:$0xff]  }
  0x19   : > { %s141_s24 = scalar_lea.vmem %s1257_s0, %s801_s4  ;;  %v907_v35 = vld [vmem:[%s1258_s1 + $0x160] ss:$8 sps:$4 sm:$0xff]   ;;  %v880_v36 = vld [vmem:[%s1258_s1 + $0x90] ss:$8 sps:$4 sm:$0xff]   ;;  %v911_v37 = vld [vmem:[%s1258_s1 + $0x174] ss:$8 sps:$4 sm:$0xff]  }
  0x1a   : > { %490 = vmatpush1.bf16.msra.mxu1 %v883_v17  ;;  %v143_v33 = vld [vmem:[%s141_s24] sm:$0xff]  ;;  %v913_v39 = vld [vmem:[%s1258_s1 + $0x170] ss:$8 sps:$4 sm:$0xff]   ;;  %v890_v41 = vld [vmem:[%s1258_s1 + $0xb4] ss:$8 sps:$4 sm:$0xff]   ;;  %vm531_vm1 = vcmask 523264  }
  0x1b   : > { %451 = vmatpush1.bf16.msra.mxu0 %v856_v8  ;;  %491 = vmatprep.subr.bf16.mxu1 %v887_v19  ;;  %v727_v34 = vcombine.high %v143_v33, %v143_v33  ;;  %v884_v38 = vld [vmem:[%s1258_s1 + $0xa4] ss:$8 sps:$4 sm:$0xff]   ;;  %v886_v40 = vld [vmem:[%s1258_s1 + $0xa0] ss:$8 sps:$4 sm:$0xff]   ;;  %v892_v43 = vld [vmem:[%s1258_s1 + $0xb0] ss:$8 sps:$4 sm:$0xff]   ;;  %v726_v52 = vcombine.low %v143_v33, %v143_v33 }
  0x1c   : > { %452 = vmatprep.subr.bf16.mxu0 %v857_v11  ;;  %v917_v42 = vld [vmem:[%s141_s24 + $0x8] ss:$0 sps:$4 sm:$0xff]   ;;  %v896_v44 = vld [vmem:[%s1258_s1 + $0xc4] ss:$8 sps:$4 sm:$0xff]   ;;  %v902_v46 = vld [vmem:[%s1258_s1 + $0xd4] ss:$8 sps:$4 sm:$0xff]  }
  0x1d   : > { %476 = vmatprep.mubr.bf16.mxu0 %v727_v34  ;;  %v898_v45 = vld [vmem:[%s1258_s1 + $0xc0] ss:$8 sps:$4 sm:$0xff]   ;;  %v904_v47 = vld [vmem:[%s1258_s1 + $0xd0] ss:$8 sps:$4 sm:$0xff]   ;;  %v908_v48 = vld [vmem:[%s1258_s1 + $0xe4] ss:$8 sps:$4 sm:$0xff]  }
  0x1e   : > { %492 = vmatpush1.bf16.msra.mxu1 %v889_v21  ;;  %v910_v49 = vld [vmem:[%s1258_s1 + $0xe0] ss:$8 sps:$4 sm:$0xff]   ;;  %v914_v50 = vld [vmem:[%s1258_s1 + $0xf4] ss:$8 sps:$4 sm:$0xff]   ;;  %v916_v51 = vld [vmem:[%s1258_s1 + $0xf0] ss:$8 sps:$4 sm:$0xff]  }
  0x1f   : > { %453 = vmatpush1.bf16.msra.mxu0 %v859_v14  ;;  %493 = vmatprep.subr.bf16.mxu1 %v893_v23  ;;  %vm599_vm2 = vcmask 1043456   ;;  %v579_v6 = vshrl.u32 %v578_v5, 7  ;;  %v581_v7 = vand.u32 127, %v578_v5  ;;  %vm584_vm4 = vcmask 64512   ;;  %s134_s29 = sand.u32 1, %s978_s10   ;;  %s780_s3 = sshll.u32 %s1029_s13, 6 }
  0x20   : > { %454 = vmatprep.subr.bf16.mxu0 %v860_v15  ;;  %s724_s30 = sshll.u32 %s134_s29, 2  ;;  %vm645_vm5 = vcmask 519168   ;;  %s1215_s24 = scalar_lea.hbm %s1259_s2, %s780_s3 }
  0x21   : > { %vm582_vm3 = vcmp.le.s32.totalorder %v581_v7, %v579_v6  ;;  %s136_s5 = scalar_lea.vmem [#allocation2], %s724_s30  ;;  %s648_s13 = scalar_lea.sflag [#allocation3], %s134_s29 }
  0x22   : > { %494 = vmatpush1.bf16.msra.mxu1 %v895_v25  ;;  %s661_s4 = sshll.u32 %s136_s5, 4  ;;  %s992_s14 = smov [#allocation2]   ;;  %s1217_s4 = int_to_ptr.vmem [resolvable:$true] %s661_s4 }
  0x23   : > { %455 = vmatpush1.bf16.msra.mxu0 %v862_v18  ;;  %495 = vmatprep.subr.bf16.mxu1 %v899_v27  ;;  %s924_s8 = scalar_lea.vmem %s1217_s4, 64  ;;  %s928_s16 = sshll.u32 %s992_s14, 4  ;;  %s929_s16 = int_to_ptr.vmem [resolvable:$false] %s928_s16 }
  0x24   : > { %456 = vmatprep.subr.bf16.mxu0 %v863_v20  ;;  %p925_p11 = scmp.ne.s32.totalorder %s1217_s4, %s924_s8  ;;  %s930_s17 = scalar_lea.vmem %s929_s16, 128 }
  0x25   : > { %p931_p0 = scmp.lt.s32.totalorder %s1217_s4, %s929_s16  ;;  %p932_p1 = scmp.lt.s32.totalorder %s930_s17, %s924_s8 }
  0x26   : > { %496 = vmatpush1.bf16.msra.mxu1 %v901_v29  ;;  %p926_p12 = pnand %p925_p11, %p1046_p5 }
  0x27   : > { %457 = vmatpush1.bf16.msra.mxu0 %v865_v22  ;;  %497 = vmatprep.subr.bf16.mxu1 %v905_v31  ;;  %p933_p2 = por %p932_p1, %p931_p0 }
  0x28   : > { %458 = vmatprep.subr.bf16.mxu0 %v866_v24  ;;  %p927_p13 = pneg %p926_p12 }
  0x2a   : > { %498 = vmatpush1.bf16.msra.mxu1 %v907_v35  ;;  %p934_p3 = pnand %p933_p2, %p927_p13 }
  0x2b   : > { %459 = vmatpush1.bf16.msra.mxu0 %v868_v26  ;;  %499 = vmatprep.subr.bf16.mxu1 %v911_v37 }
  0x2c   : > { %460 = vmatprep.subr.bf16.mxu0 %v872_v28 }
  0x2e   : > { %500 = vmatpush1.bf16.msra.mxu1 %v913_v39 }
  0x2f   : > { %461 = vmatpush1.bf16.msra.mxu0 %v874_v30  ;;  %787 = vmatprep.subr.bf16.mxu1 %v989_v57 }
  0x30   : > { %462 = vmatprep.subr.bf16.mxu0 %v878_v32 }
  0x31   : > { %518 = vmatmul.mubr.bf16.vlgmr.msra.gmra.mrb[0].mxu1 %v917_v42 }
  0x32   : > { %789 = vmatprep.mubr.msk.bf16.mxu1 %vm990_vm0, %v989_v57 }
  0x33   : > { %463 = vmatpush1.bf16.msra.mxu0 %v880_v36 }
  0x34   : > { %464 = vmatprep.subr.bf16.mxu0 %v884_v38 }
  0x37   : > { %465 = vmatpush1.bf16.msra.mxu0 %v886_v40 }
  0x38   : > { %466 = vmatprep.subr.bf16.mxu0 %v890_v41 }
  0x3b   : > { %467 = vmatpush1.bf16.msra.mxu0 %v892_v43 }
  0x3c   : > { %468 = vmatprep.subr.bf16.mxu0 %v896_v44 }
  0x3f   : > { %469 = vmatpush1.bf16.msra.mxu0 %v898_v45 }
  0x40   : > { %470 = vmatprep.subr.bf16.mxu0 %v902_v46 }
  0x43   : > { %471 = vmatpush1.bf16.msra.mxu0 %v904_v47 }
  0x44   : > { %472 = vmatprep.subr.bf16.mxu0 %v908_v48 }
  0x47   : > { %473 = vmatpush1.bf16.msra.mxu0 %v910_v49 }
  0x48   : > { %474 = vmatprep.subr.bf16.mxu0 %v914_v50 }
  0x4b   : > { %475 = vmatpush1.bf16.msra.mxu0 %v916_v51 }
  0x4e   : > { %477 = vmatmul.mubr.bf16.vlgmr.msra.gmra.mrb[0].mxu0 %v726_v52 }
 0x104   : > { %v519_v53 = vpop.f32.mrb[0].mxu1 }
 0x105   : > { %v521_v54 = vpop.f32.mrb[1].mxu1 }
 0x106   : > { %v523_v55 = vpop.f32.mrb[2].mxu1 }
 0x107   : > { %v524_v56 = vpop.f32.mrb[3].mxu1 }
 0x121   : > { %v478_v58 = vpop.f32.mrb[0].mxu0 }
 0x122   : > { %v520_v59 = vadd.f32 %v519_v53, %v478_v58  ;;  %v480_v60 = vpop.f32.mrb[1].mxu0 }
 0x123   : > { %v522_v61 = vadd.f32 %v521_v54, %v480_v60  ;;  %v482_v62 = vpop.f32.mrb[2].mxu0 }
 0x124   : > { %v526_v63 = vpack.c.bf16 %v520_v59, %v520_v59  ;;  %v483_v0 = vpop.f32.mrb[3].mxu0 }
 0x125   : > { %v527_v3 = vpack.c.bf16 %v522_v61, %v522_v61 }
 0x126   : > { %529 = vrot.lane.b32.xlu0 %v526_v63, %s991_s28 }
 0x127   : > { %v601_v4 = vsel %vm599_vm2, %v527_v3, 0 }
 0x198   : > { %v530_v1 = vpop.permute.xlu0 %529 }
 0x199   : > { %v536_v2 = vsel %vm531_vm1, %v530_v1, 0 }
 0x19a   : > { %788 = vmatpush3.bf16.xpose.msra.mxu1 %v536_v2 }
 0x19b   : > { %793 = vmatprep.subr.bf16.mxu1 %v989_v57 }
 0x1a1   : > { %790 = vmatmul.mubr.msk.bf16.vlgmr.msra.gmra.mrb[4].mxu1 %vm531_vm1, %v526_v63 }
 0x1a2   : > { %794 = vmatpush3.bf16.msra.mxu1 %v601_v4  ;;  %795 = vmatprep.mubr.msk.bf16.mxu1 %vm990_vm0, %v989_v57 }
 0x274   : > { %v572_v8 = vpop.f32.mrb[4].mxu1 }
 0x275   : > { %v583_v9 = vsel %vm582_vm3, %v572_v8, -1e+30  ;;  %v791_v10 = vpop.f32.mrb[5].mxu1 }
 0x276   : > { %v575_v11 = vpop.f32.mrb[6].mxu1  ;;  %v585_v12 = vsel %vm584_vm4, %v583_v9, -inf }
 0x277   : > { %586 = vmax.xlane.f32.xlu0 %v585_v12  ;;  %v792_v13 = vpop.f32.mrb[7].mxu1 }
 0x304   : > { %v587_v14 = vpop.xlane.xlu0 %586 }
 0x305   : > { %v588_v15 = vsub.f32 %v583_v9, %v587_v14 }
 0x307   : > { %v589_v16 = vmul.f32 1.442695, %v588_v15 }
 0x309   : > { %920 = vpow2.f32 %v589_v16 }
 0x313   : > { %v921_v17 = vpop.eup %920 }
 0x314   : > { %v591_v18 = vsel %vm584_vm4, %v921_v17, 0.0  ;;  %v595_v19 = vpack.c.bf16 %v921_v17, %v921_v17 }
 0x315   : > { %592 = vadd.xlane.f32.xlu1 %v591_v18 }
 0x316   : > { %796 = vmatmul.mubr.msk.bf16.vlgmr.msra.gmra.mrb[8].mxu1 %vm584_vm4, %v595_v19 }
 0x3a2   : > { %v593_v20 = vpop.xlane.xlu1 %592 }
 0x3a3   : > { %922 = vrcp.f32 %v593_v20 }
 0x3ad   : > { %v923_v21 = vpop.eup %922 }
 0x3e9   : > { %v637_v22 = vpop.f32.mrb[8].mxu1 }
 0x3ea   : > { %v643_v23 = vmul.f32 %v923_v21, %v637_v22  ;;  %v797_v24 = vpop.f32.mrb[9].mxu1 }
 0x3eb   : > { %v640_v25 = vpop.f32.mrb[10].mxu1 }
 0x3ec   : > { %v644_v26 = vpack.c.bf16 %v643_v23, %v643_v23  ;;  %v798_v27 = vpop.f32.mrb[11].mxu1 }
 0x3ee   : > { %646 = vst.msk [vmem:[%s136_s5] sm:$0xf] %vm645_vm5, %v644_v26 }
 0x3ef   : > { %937 = shalt.err (!%p934_p3)
}
 0x3f0   : > { %s938_s21 = scalar_lea.hbm %s1215_s24, 64  ;;  %s942_s25 = scalar_lea.hbm %s1259_s2, 128 }
 0x3f1   : > { %p939_p4 = scmp.ne.s32.totalorder %s1215_s24, %s938_s21  ;;  %p943_p9 = scmp.lt.u32.totalorder %s1215_s24, %s1259_s2 }
 0x3f2   : > { %p944_p10 = scmp.lt.u32.totalorder %s942_s25, %s938_s21  ;;  %p946_p12 = scmp.lt.u32.totalorder %s938_s21, %s1215_s24 }
 0x3f3   : > { %p940_p7 = pnand %p939_p4, %p1046_p5 }
 0x3f4   : > { %p945_p11 = por %p944_p10, %p943_p9 }
 0x3f5   : > { %p941_p8 = pneg %p940_p7 }
 0x3f6   : > { %p947_p13 = por %p946_p12, %p945_p11 }
 0x3f8   : > { %p948_p0 = pnand %p947_p13, %p941_p8 }
 0x3fa   : > { %951 = shalt.err (!%p948_p0)
}
 0x3fb   : > { %802 = dma.vmem_to_hbm [thread:$0]  (%p1046_p5), %s1217_s4, 64, %s1215_s24, %s648_s13  }
 0x3fc PF: > { %p808_p1 = scmp.ge.s32.totalorder %s986_s12, 2  ;;  %s673_s28 = sand.u32 1, %s974_s9  }
 0x3fd   : > { %s674_s29 = scalar_lea.sflag [#allocation3], %s673_s28 }
 0x3fe   : > { %p805_p2 = pnand %p808_p1, %p1050_p6 }
 0x400   : > { %969 = dma.done.wait (!%p805_p2), %s674_s29, 64  }
 0x401   : > { %971 = vsyncadd (!%p805_p2), %s674_s29, 4294967232  ;;  %p12_p3 = scmp.ge.s32.totalorder %s1033_s15, 4   ;;  %s1262_s9 = smov %s978_s10 }
 0x402   : > { %s1263_s10 = smov %s982_s11  ;;  %s1264_s11 = smov %s1044_s18 }
 0x403   : > { %s1265_s12 = smov %s1033_s15  ;;  %14 = sbr.rel (!%p12_p3) target bundleno = 3 (0x3), region = 63 }
 0x40a   :  { %679 = vsyncpa [#allocation3], 1 }
 0x40b   :  { %681 = vsyncpa [#allocation3 + $0x1], 1 }

</bundles_post_ra>
